<compile_context>
chip_gen: v5e
topology: v5e:2x2
jax: 0.10.0
libtpu: 0.0.40
codegen_flags: <defaults>
</compile_context>

<pallas_src>
import jax
import jax.numpy as jnp
from jax.experimental import pallas as pl
from jax.experimental.pallas import tpu as pltpu

LANES = 128
SUBLANES = 8
_GROUP = LANES * SUBLANES          # elements per (8,128) f32 vreg group
_NEG_PAD = -1.0e4                  # BCE(x=-1e4, y=0) == 0 exactly in f32


def _cdiv(a, b):
    return -(-a // b)


def _scl_loss_kernel(feat_ref, ret_ref, mse_out, bce_out):
    """One grid step: accumulate lane-shaped partial sums into resident outputs."""
    step = pl.program_id(1)

    @pl.when(step == 0)
    def _init():
        mse_out[...] = jnp.zeros_like(mse_out)
        bce_out[...] = jnp.zeros_like(bce_out)

    # ---- MSE partial: sum of squared differences (kept (1,8,128)-shaped) ----
    d = feat_ref[0] - feat_ref[1]                         # (tile_f, 8, 128)
    mse_out[...] += jnp.sum(d * d, axis=0, keepdims=True)

    # ---- BCE-with-logits partials; both heads share the label plane ----
    lab = ret_ref[2]

    def bce(x):
        # Numerically stable form matching torch.nn.BCEWithLogitsLoss:
        #   max(x, 0) - x*y + log(1 + exp(-|x|))
        return jnp.maximum(x, 0.0) - x * lab + jnp.log1p(jnp.exp(-jnp.abs(x)))

    b = bce(ret_ref[0]) + bce(ret_ref[1])                 # (tile_r, 8, 128)
    bce_out[...] += jnp.sum(b, axis=0, keepdims=True)


def _pack_groups(arrays, pad_values, n_groups):
    """Flatten each array, pad to n_groups*(8*128) elems, reshape to (g,8,128), stack."""
    planes = []
    for a, pv in zip(arrays, pad_values):
        flat = jnp.ravel(a).astype(jnp.float32)
        pad = n_groups * _GROUP - flat.shape[0]
        flat = jnp.pad(flat, (0, pad), constant_values=pv)
        planes.append(flat.reshape(n_groups, SUBLANES, LANES))
    return jnp.stack(planes, axis=0)


def scl_loss(features, recon_features, ret, ret_a, label_scl,
             weight_mse=10.0, weight_scl=1.0,
             num_cores=2, vmem_budget_bytes=16 * 1024 * 1024):
    assert features.shape == recon_features.shape
    assert ret.shape == ret_a.shape == label_scl.shape

    n_feat = int(features.size)
    n_ret = int(ret.size)

    gf0 = _cdiv(n_feat, _GROUP)            # (8,128)-groups needed for the feat slab
    gr0 = _cdiv(n_ret, _GROUP)             # (8,128)-groups needed for the ret slab

    # Number of sequential reduction steps so the double-buffered working set
    # (2 feat planes + 3 ret planes, x2 pipeline buffers) fits the VMEM budget.
    bytes_all_groups = (2 * gf0 + 3 * gr0) * _GROUP * 4
    steps = max(1, _cdiv(2 * bytes_all_groups, vmem_budget_bytes))

    chunks = num_cores * steps             # total tiles across (core, step)
    tile_f = _cdiv(gf0, chunks)            # feat groups per tile
    tile_r = _cdiv(gr0, chunks)            # ret groups per tile
    gf = tile_f * chunks
    gr = tile_r * chunks

    # Padded elements contribute exactly 0 to both sums (see _NEG_PAD note).
    feat_slab = _pack_groups((features, recon_features), (0.0, 0.0), gf)
    ret_slab = _pack_groups((ret, ret_a, label_scl), (_NEG_PAD, _NEG_PAD, 0.0), gr)

    feat_spec = pl.BlockSpec((2, tile_f, SUBLANES, LANES),
                             lambda c, i: (0, c * steps + i, 0, 0))
    ret_spec = pl.BlockSpec((3, tile_r, SUBLANES, LANES),
                            lambda c, i: (0, c * steps + i, 0, 0))
    part_spec = pl.BlockSpec((1, SUBLANES, LANES), lambda c, i: (c, 0, 0))

    cost = pl.CostEstimate(
        flops=4 * n_feat + 16 * n_ret,
        transcendentals=4 * n_ret,
        bytes_accessed=(feat_slab.size + ret_slab.size) * 4,
    )

    mse_part, bce_part = pl.pallas_call(
        _scl_loss_kernel,
        out_shape=(
            jax.ShapeDtypeStruct((num_cores, SUBLANES, LANES), jnp.float32),
            jax.ShapeDtypeStruct((num_cores, SUBLANES, LANES), jnp.float32),
        ),
        grid_spec=pltpu.PrefetchScalarGridSpec(
            num_scalar_prefetch=0,
            grid=(num_cores, steps),
            in_specs=[feat_spec, ret_spec],
            out_specs=[part_spec, part_spec],
        ),
        compiler_params=pltpu.CompilerParams(
            dimension_semantics=("parallel", "arbitrary"),
            vmem_limit_bytes=32 * 1024 * 1024,
        ),
        cost_estimate=cost,
    )(feat_slab, ret_slab)

    # Tiny final reductions (num_cores * 1024 elements each) + weighted combine.
    loss_recon = jnp.sum(mse_part) / n_feat
    loss_scl = jnp.sum(bce_part) / n_ret          # == bce(ret) + bce(ret_a) means
    return weight_mse * loss_recon + weight_scl * loss_scl


def _reference(features, recon_features, ret, ret_a, label_scl,
               weight_mse=10.0, weight_scl=1.0):
    mse = jnp.mean((features - recon_features) ** 2)

    def bce(x, y):
        return jnp.mean(jnp.maximum(x, 0.0) - x * y + jnp.log1p(jnp.exp(-jnp.abs(x))))

    return weight_mse * mse + weight_scl * (bce(ret, label_scl) + bce(ret_a, label_scl))


if __name__ == "__main__":
    key = jax.random.PRNGKey(0)

    # Case 1: the shapes implied by the module's usage (small, tile-aligned).
    k1, k2, k3, k4, k5 = jax.random.split(key, 5)
    N, D_FEAT, D_RET = 128, 64, 8
    features = jax.random.normal(k1, (N, D_FEAT), dtype=jnp.float32)
    recon_features = features + 0.1 * jax.random.normal(k2, (N, D_FEAT), dtype=jnp.float32)
    ret = jax.random.normal(k3, (N, D_RET), dtype=jnp.float32)
    ret_a = jax.random.normal(k4, (N, D_RET), dtype=jnp.float32)
    label_scl = (jax.random.uniform(k5, (N, D_RET)) > 0.5).astype(jnp.float32)

    loss = scl_loss(features, recon_features, ret, ret_a, label_scl)
    jax.block_until_ready(loss)
    ref = _reference(features, recon_features, ret, ret_a, label_scl)
    assert jnp.allclose(loss, ref, rtol=1e-5, atol=1e-5), (loss, ref)

    # Case 2: ragged, non-aligned shapes (exercises the zero-contribution padding).
    k6, k7, k8, k9, k10 = jax.random.split(jax.random.PRNGKey(1), 5)
    N2, D_FEAT2, D_RET2 = 37, 50, 3
    f2 = jax.random.normal(k6, (N2, D_FEAT2), dtype=jnp.float32)
    r2 = f2 + 0.05 * jax.random.normal(k7, (N2, D_FEAT2), dtype=jnp.float32)
    x2 = jax.random.normal(k8, (N2, D_RET2), dtype=jnp.float32)
    xa2 = jax.random.normal(k9, (N2, D_RET2), dtype=jnp.float32)
    y2 = (jax.random.uniform(k10, (N2, D_RET2)) > 0.5).astype(jnp.float32)

    loss2 = scl_loss(f2, r2, x2, xa2, y2, weight_mse=3.0, weight_scl=0.5)
    jax.block_until_ready(loss2)
    ref2 = _reference(f2, r2, x2, xa2, y2, weight_mse=3.0, weight_scl=0.5)
    assert jnp.allclose(loss2, ref2, rtol=1e-5, atol=1e-5), (loss2, ref2)

    print("KERNEL_OK")
</pallas_src>

<mosaic_0001>
module attributes {stable_mosaic.version = 11 : i64} {
  func.func @_scl_loss_kernel(%arg0: i32, %arg1: i32, %arg2: memref<2x4x8x128xf32, #tpu.memory_space<vmem>>, %arg3: memref<3x1x8x128xf32, #tpu.memory_space<vmem>>, %arg4: memref<1x8x128xf32, #tpu.memory_space<vmem>>, %arg5: memref<1x8x128xf32, #tpu.memory_space<vmem>>) attributes {dimension_semantics = [#tpu.dimension_semantics<parallel>, #tpu.dimension_semantics<arbitrary>], iteration_bounds = array<i64: 2, 1>, scalar_prefetch = 0 : i64, scratch_operands = 0 : i64, tpu.core_type = #tpu.core_type<tc>, window_params = [{transform_indices = @transform_0, window_bounds = array<i64: 2, 4, 8, 128>}, {transform_indices = @transform_1, window_bounds = array<i64: 3, 1, 8, 128>}, {transform_indices = @transform_2, window_bounds = array<i64: 1, 8, 128>}, {transform_indices = @transform_3, window_bounds = array<i64: 1, 8, 128>}]} {
    %c0_i32 = arith.constant 0 : i32
    %0 = arith.cmpi eq, %arg1, %c0_i32 : i32
    %1 = arith.extui %0 : i1 to i32
    %c0_i32_0 = arith.constant 0 : i32
    %2 = arith.cmpi ne, %1, %c0_i32_0 : i32
    scf.if %2 {
      %cst_35 = arith.constant 0.000000e+00 : f32
      %46 = vector.broadcast %cst_35 : f32 to vector<1x8x128xf32>
      %c0_36 = arith.constant 0 : index
      %c0_37 = arith.constant 0 : index
      %c0_38 = arith.constant 0 : index
      %47 = vector.load %arg4[%c0_36, %c0_37, %c0_38] : memref<1x8x128xf32, #tpu.memory_space<vmem>>, vector<1x8x128xf32>
      tpu.vector_store %arg4[%c0_36, %c0_37, %c0_38], %46 {strides = array<i32>} : memref<1x8x128xf32, #tpu.memory_space<vmem>>, vector<1x8x128xf32>,
      %cst_39 = arith.constant 0.000000e+00 : f32
      %48 = vector.broadcast %cst_39 : f32 to vector<1x8x128xf32>
      %c0_40 = arith.constant 0 : index
      %c0_41 = arith.constant 0 : index
      %c0_42 = arith.constant 0 : index
      %49 = vector.load %arg5[%c0_40, %c0_41, %c0_42] : memref<1x8x128xf32, #tpu.memory_space<vmem>>, vector<1x8x128xf32>
      tpu.vector_store %arg5[%c0_40, %c0_41, %c0_42], %48 {strides = array<i32>} : memref<1x8x128xf32, #tpu.memory_space<vmem>>, vector<1x8x128xf32>,
    } else {
    }
    %c0 = arith.constant 0 : index
    %c0_1 = arith.constant 0 : index
    %c0_2 = arith.constant 0 : index
    %c0_3 = arith.constant 0 : index
    %3 = vector.load %arg2[%c0, %c0_1, %c0_2, %c0_3] : memref<2x4x8x128xf32, #tpu.memory_space<vmem>>, vector<1x4x8x128xf32>
    %4 = vector.shape_cast %3 : vector<1x4x8x128xf32> to vector<4x8x128xf32>
    %c1 = arith.constant 1 : index
    %c0_4 = arith.constant 0 : index
    %c0_5 = arith.constant 0 : index
    %c0_6 = arith.constant 0 : index
    %5 = vector.load %arg2[%c1, %c0_4, %c0_5, %c0_6] : memref<2x4x8x128xf32, #tpu.memory_space<vmem>>, vector<1x4x8x128xf32>
    %6 = vector.shape_cast %5 : vector<1x4x8x128xf32> to vector<4x8x128xf32>
    %7 = arith.subf %4, %6 : vector<4x8x128xf32>
    %c0_7 = arith.constant 0 : index
    %c0_8 = arith.constant 0 : index
    %c0_9 = arith.constant 0 : index
    %8 = vector.load %arg4[%c0_7, %c0_8, %c0_9] : memref<1x8x128xf32, #tpu.memory_space<vmem>>, vector<1x8x128xf32>
    %9 = arith.mulf %7, %7 : vector<4x8x128xf32>
    %cst = arith.constant dense<0.000000e+00> : vector<8x128xf32>
    %10 = vector.multi_reduction <add>, %9, %cst [0] : vector<4x8x128xf32> to vector<8x128xf32>
    %11 = vector.shape_cast %10 : vector<8x128xf32> to vector<1x8x128xf32>
    %12 = arith.addf %8, %11 : vector<1x8x128xf32>
    %c0_10 = arith.constant 0 : index
    %c0_11 = arith.constant 0 : index
    %c0_12 = arith.constant 0 : index
    %13 = vector.load %arg4[%c0_10, %c0_11, %c0_12] : memref<1x8x128xf32, #tpu.memory_space<vmem>>, vector<1x8x128xf32>
    tpu.vector_store %arg4[%c0_10, %c0_11, %c0_12], %12 {strides = array<i32>} : memref<1x8x128xf32, #tpu.memory_space<vmem>>, vector<1x8x128xf32>,
    %c2 = arith.constant 2 : index
    %c0_13 = arith.constant 0 : index
    %c0_14 = arith.constant 0 : index
    %c0_15 = arith.constant 0 : index
    %14 = vector.load %arg3[%c2, %c0_13, %c0_14, %c0_15] : memref<3x1x8x128xf32, #tpu.memory_space<vmem>>, vector<1x1x8x128xf32>
    %15 = vector.shape_cast %14 : vector<1x1x8x128xf32> to vector<1x8x128xf32>
    %c0_16 = arith.constant 0 : index
    %c0_17 = arith.constant 0 : index
    %c0_18 = arith.constant 0 : index
    %c0_19 = arith.constant 0 : index
    %16 = vector.load %arg3[%c0_16, %c0_17, %c0_18, %c0_19] : memref<3x1x8x128xf32, #tpu.memory_space<vmem>>, vector<1x1x8x128xf32>
    %17 = vector.shape_cast %16 : vector<1x1x8x128xf32> to vector<1x8x128xf32>
    %cst_20 = arith.constant 0.000000e+00 : f32
    %18 = vector.broadcast %cst_20 : f32 to vector<1x8x128xf32>
    %19 = arith.maximumf %17, %18 : vector<1x8x128xf32>
    %20 = arith.mulf %17, %15 : vector<1x8x128xf32>
    %21 = arith.subf %19, %20 : vector<1x8x128xf32>
    %22 = math.absf %17 : vector<1x8x128xf32>
    %cst_21 = arith.constant 0.000000e+00 : f32
    %23 = vector.broadcast %cst_21 : f32 to vector<1x8x128xf32>
    %24 = arith.subf %23, %22 : vector<1x8x128xf32>
    %25 = math.exp %24 : vector<1x8x128xf32>
    %26 = math.log1p %25 : vector<1x8x128xf32>
    %27 = arith.addf %21, %26 : vector<1x8x128xf32>
    %c1_22 = arith.constant 1 : index
    %c0_23 = arith.constant 0 : index
    %c0_24 = arith.constant 0 : index
    %c0_25 = arith.constant 0 : index
    %28 = vector.load %arg3[%c1_22, %c0_23, %c0_24, %c0_25] : memref<3x1x8x128xf32, #tpu.memory_space<vmem>>, vector<1x1x8x128xf32>
    %29 = vector.shape_cast %28 : vector<1x1x8x128xf32> to vector<1x8x128xf32>
    %cst_26 = arith.constant 0.000000e+00 : f32
    %30 = vector.broadcast %cst_26 : f32 to vector<1x8x128xf32>
    %31 = arith.maximumf %29, %30 : vector<1x8x128xf32>
    %32 = arith.mulf %29, %15 : vector<1x8x128xf32>
    %33 = arith.subf %31, %32 : vector<1x8x128xf32>
    %34 = math.absf %29 : vector<1x8x128xf32>
    %cst_27 = arith.constant 0.000000e+00 : f32
    %35 = vector.broadcast %cst_27 : f32 to vector<1x8x128xf32>
    %36 = arith.subf %35, %34 : vector<1x8x128xf32>
    %37 = math.exp %36 : vector<1x8x128xf32>
    %38 = math.log1p %37 : vector<1x8x128xf32>
    %39 = arith.addf %33, %38 : vector<1x8x128xf32>
    %40 = arith.addf %27, %39 : vector<1x8x128xf32>
    %c0_28 = arith.constant 0 : index
    %c0_29 = arith.constant 0 : index
    %c0_30 = arith.constant 0 : index
    %41 = vector.load %arg5[%c0_28, %c0_29, %c0_30] : memref<1x8x128xf32, #tpu.memory_space<vmem>>, vector<1x8x128xf32>
    %cst_31 = arith.constant dense<0.000000e+00> : vector<8x128xf32>
    %42 = vector.multi_reduction <add>, %40, %cst_31 [0] : vector<1x8x128xf32> to vector<8x128xf32>
    %43 = vector.shape_cast %42 : vector<8x128xf32> to vector<1x8x128xf32>
    %44 = arith.addf %41, %43 : vector<1x8x128xf32>
    %c0_32 = arith.constant 0 : index
    %c0_33 = arith.constant 0 : index
    %c0_34 = arith.constant 0 : index
    %45 = vector.load %arg5[%c0_32, %c0_33, %c0_34] : memref<1x8x128xf32, #tpu.memory_space<vmem>>, vector<1x8x128xf32>
    tpu.vector_store %arg5[%c0_32, %c0_33, %c0_34], %44 {strides = array<i32>} : memref<1x8x128xf32, #tpu.memory_space<vmem>>, vector<1x8x128xf32>,
    return
  }
  func.func @transform_0(%arg0: i32, %arg1: i32) -> (i32, i32, i32, i32) {
    %c1_i32 = arith.constant 1 : i32
    %0 = arith.muli %arg0, %c1_i32 : i32
    %1 = arith.addi %0, %arg1 : i32
    %c0_i32 = arith.constant 0 : i32
    %c0_i32_0 = arith.constant 0 : i32
    %c0_i32_1 = arith.constant 0 : i32
    %c0_i32_2 = arith.constant 0 : i32
    return %c0_i32, %1, %c0_i32_0, %c0_i32_1 : i32, i32, i32, i32
  }
  func.func @transform_1(%arg0: i32, %arg1: i32) -> (i32, i32, i32, i32) {
    %c1_i32 = arith.constant 1 : i32
    %0 = arith.muli %arg0, %c1_i32 : i32
    %1 = arith.addi %0, %arg1 : i32
    %c0_i32 = arith.constant 0 : i32
    %c0_i32_0 = arith.constant 0 : i32
    %c0_i32_1 = arith.constant 0 : i32
    %c0_i32_2 = arith.constant 0 : i32
    return %c0_i32, %1, %c0_i32_0, %c0_i32_1 : i32, i32, i32, i32
  }
  func.func @transform_2(%arg0: i32, %arg1: i32) -> (i32, i32, i32) {
    %c0_i32 = arith.constant 0 : i32
    %c0_i32_0 = arith.constant 0 : i32
    %c0_i32_1 = arith.constant 0 : i32
    return %arg0, %c0_i32, %c0_i32_0 : i32, i32, i32
  }
  func.func @transform_3(%arg0: i32, %arg1: i32) -> (i32, i32, i32) {
    %c0_i32 = arith.constant 0 : i32
    %c0_i32_0 = arith.constant 0 : i32
    %c0_i32_1 = arith.constant 0 : i32
    return %arg0, %c0_i32, %c0_i32_0 : i32, i32, i32
  }
}

</mosaic_0001>

<bundles_post_ra>
// kernel: tpu_custom_call.1
= control target key start
LH: loop header
LB: loop body
LE: loop exit
PB: predicated region body
PF: predicated region fallthrough
CT: control target
= control target key end

     0   :  { %s1014_s0 = inlined_call_operand.hbm [shape: f32[2,8,8,128], index: 0, kind: input, shape index: {}]   ;;  %s1015_s1 = inlined_call_operand.hbm [shape: f32[3,2,8,128], index: 1, kind: input, shape index: {}]   ;;  %s1016_s2 = inlined_call_operand.hbm [shape: f32[2,8,128], index: 2, kind: output, shape index: {0}]   ;;  %s1017_s3 = inlined_call_operand.hbm [shape: f32[2,8,128], index: 3, kind: output, shape index: {1}]  }
   0x1   :  { %1019 = sst [smem:[#allocation19_spill]] %s1014_s0 }
   0x2   :  { %9 = vsyncpa [#allocation3], 0 }
   0x3   :  { %11 = vsyncpa [#allocation3 + $0x1], 0 }
   0x4   :  { %12 = vsyncpa [#allocation6], 0 }
   0x5   :  { %14 = vsyncpa [#allocation6 + $0x1], 0 }
   0x6   :  { %15 = vsyncpa [#allocation4], 0 }
   0x7   :  { %17 = vsyncpa [#allocation4 + $0x1], 0 }
   0x8   :  { %18 = vsyncpa [#allocation9], 0 }
   0x9   :  { %20 = vsyncpa [#allocation9 + $0x1], 0  ;;  %s828_s12 = smov 0   ;;  %s830_s13 = smov 0  }
   0xa   :  { %s832_s14 = smov 0   ;;  %s834_s15 = smov 0  }
   0xb   :  { %s836_s16 = smov 0   ;;  %s838_s17 = smov 0  }
   0xc LB: > { %s533_s18 = sadd.s32 4294967295, %s797_s17   ;;  %s534_s19 = sadd.s32 4294967294, %s797_s17   ;;  %s797_s17 = sphi %s838_s17, %s26_s17   ;;  %s793_s16 = sphi %s836_s16, %s1033_s16   ;;  %s789_s15 = sphi %s834_s15, %s1032_s15   ;;  %s785_s14 = sphi %s832_s14, %s1031_s14   ;;  %s781_s13 = sphi %s830_s13, %s1030_s13   ;;  %s777_s12 = sphi %s828_s12, %s1029_s12  }
   0xd   : > { %s38_s20 = sadd.s32 1, %s793_s16  ;;  %s47_s21 = sadd.s32 1, %s785_s14 }
   0xe   : > { %p40_p0 = scmp.ge.s32.totalorder %s38_s20, 2  ;;  %p54_p1 = scmp.ne.s32.totalorder %s785_s14, %s781_s13 }
   0xf   : > { %p55_p2 = scmp.eq.s32.totalorder %s797_s17, 0  ;;  %p60_p3 = scmp.ne.s32.totalorder %s781_s13, %s777_s12 }
  0x10   : > { %s1035_s20 = smov (%p40_p0, %s38_s20), 0  ;;  %p61_p5 = scmp.eq.s32.totalorder %s533_s18, 0 }
  0x11   : > { %1020 = sst [smem:[#allocation17_spill]] %s1035_s20  ;;  %p869_p4 = por %p55_p2, %p54_p1 }
  0x12   : > { %s44_s23 = ssub.s32 %s793_s16, %s1035_s20  ;;  %p112_p6 = scmp.eq.s32.totalorder %s533_s18, 1 }
  0x13   : > { %p45_p7 = scmp.eq.s32.totalorder %s44_s23, 0  ;;  %p875_p8 = por %p61_p5, %p60_p3 }
  0x14   : > { %p879_p9 = por %p112_p6, %p54_p1  ;;  %p118_p10 = scmp.eq.s32.totalorder %s534_s19, 1 }
  0x15   : > { %s884_s26 = scalar_select %p45_p7, %s785_s14, %s47_s21  }
  0x16   : > { %p886_p11 = por %p118_p10, %p60_p3  ;;  %p536_p12 = scmp.ge.s32.totalorder %s797_s17, 2 }
  0x17   : > { %1024 = sst [smem:[#allocation18_spill]] %s884_s26 }
  0x18   : > { %160 = sbr.rel (%p536_p12) target bundleno = 49 (0x31), region = 16 }
  0x1d   : > { %s894_s28 = sand.u32 1, %s785_s14   ;;  %s559_s29 = sshll.u32 %s793_s16, 5 }
  0x1e   : > { %s537_s30 = sshll.u32 %s894_s28, 6  ;;  %s1026_s0 = sld [smem:[#allocation19_spill]] }
  0x1f   : > { %s562_s7 = scalar_select %p869_p4, [#allocation0], [#allocation12] }
  0x20   : > { %s168_s9 = scalar_lea.vmem [#allocation2], %s537_s30  ;;  %s799_s18 = smov 1024  }
  0x21   : > { %s189_s10 = sshll.u32 %s168_s9, 4  ;;  %s179_s11 = sld [smem:[%s562_s7]]   ;;  %s190_s10 = int_to_ptr.vmem [resolvable:$true] %s189_s10 }
  0x22   : > { %563 = sst [smem:[#allocation11]] (%p869_p4), %s799_s18  ;;  %s800_s19 = smov 512  }
  0x23   : > { %564 = sst [smem:[#allocation11 + $0x1]] (%p869_p4), %s800_s19  ;;  %s801_s21 = smov 4  }
  0x24   : > { %s174_s6 = scalar_lea.hbm %s1026_s0, %s559_s29  ;;  %565 = sst [smem:[#allocation11 + $0x2]] (%p869_p4), %s801_s21 }
  0x25   : > { %s187_s8 = sshll.u32 %s174_s6, 4  ;;  %s802_s23 = smov 128   ;;  %s188_s8 = int_to_ptr.hbm [resolvable:$true] %s187_s8 }
  0x26   : > { %566 = sst [smem:[#allocation11 + $0x3]] (%p869_p4), %s802_s23  ;;  %s803_s4 = smov 8  }
  0x27   : > { %s540_s29 = sshll.u32 %s179_s11, 26  ;;  %567 = sst [smem:[#allocation11 + $0x4]] (%p869_p4), %s802_s23 }
  0x28   : > { %s541_s30 = sadd.s32 134217728, %s540_s29  ;;  %568 = sst [smem:[#allocation11 + $0x5]] (%p869_p4), %s803_s4 }
  0x29   : > { %s165_s5 = scalar_lea.sflag [#allocation3], %s894_s28  ;;  %s804_s6 = smov [#allocation10]  }
  0x2a   : > { %569 = dma.general (%p869_p4), %s188_s8, 1024, %s190_s10, %s165_s5, %s804_s6, [#allocation11], %s541_s30, 0  }
  0x2b   : > { %s560_s7 = smul.u32 24, %s894_s28  ;;  %s542_s9 = sshll.u32 %s793_s16, 3 }
  0x2c   : > { %s221_s11 = scalar_lea.hbm %s1015_s1, %s542_s9  ;;  %s213_s4 = scalar_lea.sflag [#allocation6], %s894_s28 }
  0x2d   : > { %s222_s21 = sshll.u32 %s221_s11, 4  ;;  %s216_s23 = scalar_lea.vmem [#allocation5], %s560_s7  ;;  %s223_s21 = int_to_ptr.hbm [resolvable:$true] %s222_s21 }
  0x2e   : > { %s224_s29 = sshll.u32 %s216_s23, 4  ;;  %s805_s0 = smov 256   ;;  %s225_s29 = int_to_ptr.vmem [resolvable:$true] %s224_s29 }
  0x2f   : > { %s806_s20 = smov 128   ;;  %s807_s26 = smov 8  }
  0x30   : > { %570 = dma.hbm_to_vmem [thread:$0]  (%p869_p4), %s223_s21, 384, %s225_s29, %s213_s4, %s805_s0, %s806_s20, %s807_s26  }
  0x31 PF: > { %p543_p13 = scmp.ge.s32.totalorder %s797_s17, 1  ;;  %p232_p0 = scmp.lt.s32.totalorder %s797_s17, 3 }
  0x33   : > { %p233_p1 = pnand %p543_p13, %p232_p0 }
  0x34   : > { %s929_s8 = sand.u32 (!%p233_p1), 1, %s781_s13  }
  0x35   : > { %236 = sbr.rel (%p233_p1) target bundleno = 100 (0x64), region = 28  ;;  %s544_s10 = sshll.u32 (!%p233_p1), %s929_s8, 6 }
  0x36   : > { %s239_s28 = scalar_lea.sflag (!%p233_p1), [#allocation3], %s929_s8  ;;  %s242_s30 = scalar_lea.vmem (!%p233_p1), [#allocation2], %s544_s10 }
  0x3a   : > { %760 = dma.done.wait (%p875_p8), %s239_s28, 1024  }
  0x3b   : > { %762 = vsyncadd (%p875_p8), %s239_s28, 4294966272  ;;  %s561_s0 = smul.u32 24, %s929_s8  ;;  %s249_s20 = scalar_lea.sflag [#allocation6], %s929_s8 }
  0x3d   : > { %s939_s22 = scalar_lea.vmem [#allocation5], %s561_s0 }
  0x3e   : > { %764 = dma.done.wait (%p875_p8), %s249_s20, 384  }
  0x3f   : > { %766 = vsyncadd (%p875_p8), %s249_s20, 4294966912  ;;  %v295_v0 = vld [vmem:[%s242_s30] sm:$0xff]  ;;  %v296_v1 = vld [vmem:[%s242_s30 + $0x8] sm:$0xff]  ;;  %s545_s26 = sshll.u32 %s929_s8, 3  ;;  %s555_s24 = sshll.u32 %s789_s15, 3 }
  0x40   : > { %v297_v2 = vld [vmem:[%s242_s30 + $0x10] sm:$0xff]  ;;  %v298_v3 = vld [vmem:[%s242_s30 + $0x18] sm:$0xff]  ;;  %v547_v4 = vld [vmem:[%s242_s30 + $0x20] sm:$0xff]  ;;  %s378_s7 = scalar_lea.hbm %s1016_s2, %s555_s24  ;;  %s278_s9 = scalar_lea.vmem [#allocation7], %s545_s26 }
  0x41   : > { %v548_v5 = vld [vmem:[%s242_s30 + $0x28] sm:$0xff]  ;;  %v549_v6 = vld [vmem:[%s242_s30 + $0x30] sm:$0xff]  ;;  %v550_v7 = vld [vmem:[%s242_s30 + $0x38] sm:$0xff]  ;;  %v304_v8 = vsub.f32 %v295_v0, %v547_v4  ;;  %s380_s18 = sshll.u32 %s278_s9, 4  ;;  %s382_s19 = sshll.u32 %s378_s7, 4  ;;  %s381_s18 = int_to_ptr.vmem [resolvable:$true] %s380_s18  ;;  %s383_s19 = int_to_ptr.hbm [resolvable:$true] %s382_s19 }
  0x42   : > { %v305_v9 = vsub.f32 %v296_v1, %v548_v5  ;;  %v306_v10 = vsub.f32 %v297_v2, %v549_v6  ;;  %v307_v11 = vsub.f32 %v298_v3, %v550_v7  ;;  %v320_v12 = vld [vmem:[%s939_s22] sm:$0xff]  ;;  %v948_v13 = vld [vmem:[%s939_s22 + $0x8] sm:$0xff]  ;;  %s363_s11 = scalar_lea.sflag [#allocation4], %s929_s8  ;;  %s693_s21 = sshra.s32 %s383_s19, 4  ;;  %s694_s21 = int_to_ptr.hbm [resolvable:$true] %s693_s21 }
  0x43   : > { %v309_v14 = vmul.f32 %v304_v8, %v304_v8  ;;  %v324_v17 = vand.u32 2147483647, %v320_v12  ;;  %v343_v20 = vand.u32 2147483647, %v948_v13  ;;  %s695_s23 = scalar_lea.hbm %s694_s21, 8  ;;  %s699_s10 = scalar_lea.hbm %s1016_s2, 16 }
  0x44   : > { %v310_v15 = vmul.f32 %v305_v9, %v305_v9  ;;  %v311_v16 = vmul.f32 %v306_v10, %v306_v10  ;;  %v312_v18 = vmul.f32 %v307_v11, %v307_v11  ;;  %p696_p2 = scmp.ne.s32.totalorder %s694_s21, %s695_s23  ;;  %p700_p5 = scmp.lt.s32.totalorder %s694_s21, %s1016_s2 }
  0x45   : > { %v325_v21 = vsub.f32 0.0, %v324_v17  ;;  %v344_v23 = vsub.f32 0.0, %v343_v20  ;;  %p701_p6 = scmp.lt.s32.totalorder %s699_s10, %s695_s23 }
  0x46   : > { %v313_v19 = vadd.f32 %v310_v15, %v309_v14  ;;  %p697_p3 = pnand %p696_p2, %p879_p9 }
  0x47   : > { %v326_v24 = vmul.f32 1.442695, %v325_v21  ;;  %v345_v26 = vmul.f32 1.442695, %v344_v23  ;;  %p702_p7 = por %p701_p6, %p700_p5 }
  0x48   : > { %v314_v22 = vadd.f32 %v313_v19, %v311_v16  ;;  %p698_p4 = pneg %p697_p3 }
  0x49   : > { %643 = vpow2.f32 %v326_v24 }
  0x4a   : > { %v315_v25 = vadd.f32 %v314_v22, %v312_v18  ;;  %645 = vpow2.f32 %v345_v26  ;;  %p703_p8 = pnand %p702_p7, %p698_p4 }
  0x4c   : > { %317 = vst [vmem:[%s278_s9] sm:$0xff] %v315_v25 }
  0x4d   : > { %706 = shalt.err (!%p703_p8)
}
  0x4e   : > { %573 = dma.vmem_to_hbm [thread:$0]  (%p879_p9), %s381_s18, 128, %s383_s19, %s363_s11   ;;  %v551_v31 = vld [vmem:[%s939_s22 + $0x10] sm:$0xff]  ;;  %v321_v35 = vmax.f32 %v320_v12, 0.0  ;;  %v340_v39 = vmax.f32 %v948_v13, 0.0 }
  0x4f   : > { %v644_v27 = vpop.eup %643  ;;  %v322_v36 = vmul.f32 %v551_v31, %v320_v12  ;;  %v341_v40 = vmul.f32 %v948_v13, %v551_v31  ;;  %s392_s22 = scalar_lea.hbm %s1017_s3, %s555_s24  ;;  %s285_s5 = scalar_lea.vmem [#allocation8], %s545_s26 }
  0x50   : > { %v646_v28 = vpop.eup %645  ;;  %v328_v29 = vadd.f32 1.0, %v644_v27  ;;  %v331_v30 = vmul.f32 -0.5, %v644_v27  ;;  %v334_v37 = vand.u32 2147483647, %v644_v27  ;;  %s394_s6 = sshll.u32 %s285_s5, 4  ;;  %s396_s7 = sshll.u32 %s392_s22, 4  ;;  %s395_s6 = int_to_ptr.vmem [resolvable:$true] %s394_s6  ;;  %s397_s7 = int_to_ptr.hbm [resolvable:$true] %s396_s7 }
  0x51   : > { %v347_v32 = vadd.f32 1.0, %v646_v28  ;;  %v350_v33 = vmul.f32 -0.5, %v646_v28  ;;  %v353_v41 = vand.u32 2147483647, %v646_v28  ;;  %v323_v44 = vsub.f32 %v321_v35, %v322_v36  ;;  %s368_s9 = scalar_lea.sflag [#allocation9], %s929_s8  ;;  %s721_s18 = sshra.s32 %s397_s7, 4  ;;  %s722_s18 = int_to_ptr.hbm [resolvable:$true] %s721_s18 }
  0x52   : > { %647 = vlog2.f32 %v328_v29  ;;  %v332_v34 = vadd.f32 1.0, %v331_v30  ;;  %vm335_vm0 = vcmp.lt.f32.partialorder %v334_v37, 0.0004427343  ;;  %v342_v48 = vsub.f32 %v340_v39, %v341_v40  ;;  %s723_s15 = scalar_lea.hbm %s722_s18, 8  ;;  %s727_s11 = scalar_lea.hbm %s1017_s3, 16 }
  0x53   : > { %649 = vlog2.f32 %v347_v32  ;;  %v351_v38 = vadd.f32 1.0, %v350_v33  ;;  %vm354_vm1 = vcmp.lt.f32.partialorder %v353_v41, 0.0004427343  ;;  %p724_p10 = scmp.ne.s32.totalorder %s722_s18, %s723_s15  ;;  %p728_p1 = scmp.lt.s32.totalorder %s722_s18, %s1017_s3 }
  0x54   : > { %v333_v42 = vmul.f32 %v644_v27, %v332_v34  ;;  %p729_p2 = scmp.lt.s32.totalorder %s727_s11, %s723_s15 }
  0x55   : > { %v352_v45 = vmul.f32 %v646_v28, %v351_v38  ;;  %p725_p13 = pnand %p724_p10, %p879_p9 }
  0x56   : > { %p730_p3 = por %p729_p2, %p728_p1 }
  0x57   : > { %p726_p0 = pneg %p725_p13 }
  0x58   : > { %v648_v43 = vpop.eup %647 }
  0x59   : > { %v650_v46 = vpop.eup %649  ;;  %v330_v47 = vmul.f32 0.6931472, %v648_v43  ;;  %p731_p4 = pnand %p730_p3, %p726_p0 }
  0x5a   : > { %v349_v49 = vmul.f32 0.6931472, %v650_v46 }
  0x5b   : > { %v336_v50 = vsel %vm335_vm0, %v333_v42, %v330_v47 }
  0x5c   : > { %v337_v51 = vadd.f32 %v336_v50, %v323_v44  ;;  %v355_v52 = vsel %vm354_vm1, %v352_v45, %v349_v49 }
  0x5d   : > { %v356_v53 = vadd.f32 %v355_v52, %v342_v48 }
  0x5f   : > { %v357_v54 = vadd.f32 %v356_v53, %v337_v51 }
  0x61   : > { %361 = vst [vmem:[%s285_s5] sm:$0xff] %v357_v54 }
  0x62   : > { %734 = shalt.err (!%p731_p4)
}
  0x63   : > { %574 = dma.vmem_to_hbm [thread:$0]  (%p879_p9), %s395_s6, 128, %s397_s7, %s368_s9  }
  0x64 PF: > { %s408_s8 = sand.u32 1, %s777_s12   ;;  %p578_p5 = pnand %p536_p12, %p886_p11 }
  0x65   : > { %s409_s23 = scalar_lea.sflag [#allocation4], %s408_s8 }
  0x66   : > { %p579_p6 = pneg %p578_p5 }
  0x68   : > { %768 = dma.done.wait (%p579_p6), %s409_s23, 128  }
  0x69   : > { %770 = vsyncadd (%p579_p6), %s409_s23, 4294967168  ;;  %s419_s29 = scalar_lea.sflag [#allocation9], %s408_s8 }
  0x6a   : > { %772 = dma.done.wait (%p579_p6), %s419_s29, 128  }
  0x6b   : > { %774 = vsyncadd (%p579_p6), %s419_s29, 4294967168  ;;  %s26_s17 = sadd.s32 1, %s797_s17   ;;  %s1027_s25 = sld [smem:[#allocation18_spill]] }
  0x6c   : > { %p23_p7 = scmp.ge.s32.totalorder %s26_s17, 4   ;;  %s1028_s4 = sld [smem:[#allocation17_spill]] }
  0x6d   : > { %s1029_s12 = smov %s781_s13  ;;  %s1030_s13 = smov %s785_s14 }
  0x6e   : > { %s1032_s15 = smov %s793_s16  ;;  %25 = sbr.rel (!%p23_p7) target bundleno = 12 (0xc), region = 115 }
  0x71   : > { %s1031_s14 = smov %s1027_s25 }
  0x72   : > { %s1033_s16 = smov %s1028_s4 }
  0x73   :  { %425 = vsyncpa [#allocation3], 1 }
  0x74   :  { %427 = vsyncpa [#allocation3 + $0x1], 1 }
  0x75   :  { %428 = vsyncpa [#allocation6], 1 }
  0x76   :  { %430 = vsyncpa [#allocation6 + $0x1], 1 }
  0x77   :  { %431 = vsyncpa [#allocation4], 1 }
  0x78   :  { %433 = vsyncpa [#allocation4 + $0x1], 1 }
  0x79   :  { %434 = vsyncpa [#allocation9], 1 }
  0x7a   :  { %436 = vsyncpa [#allocation9 + $0x1], 1 }

</bundles_post_ra>
